<compile_context>
chip_gen: v7x
topology: tpu7x:2x2x1
jax: 0.10.0
libtpu: 0.0.40
codegen_flags: <defaults>
</compile_context>

<pallas_src>
import jax
import jax.numpy as jnp
from jax.experimental import pallas as pl
from jax.experimental.pallas import tpu as pltpu


def _round_up(n, m):
    return ((n + m - 1) // m) * m


def _freqlinear_kernel(x_ref, w_ref, b_ref, o_ref):
    # (TB, C) @ (C, M) with f32 accumulation, plus bias broadcast.
    # K = C is tiny so the MXU is lightly used, but the kernel is output-
    # writeback bound; the dot is not on the critical (store/DMA) slot.
    o_ref[...] = (
        jnp.dot(x_ref[...], w_ref[...], preferred_element_type=jnp.float32)
        + b_ref[...]
    )


def freq_linear(x, weights, bias, modes1, modes2, *, tb=None):
    """FreqLinear forward.

    x:       (B, C) float32
    weights: (C, 4*m1*m2) float32
    bias:    (1, 4*m1*m2) float32
    Returns complex64 of shape (B, m1, m2, 2), matching
    torch.view_as_complex(h.reshape(B, m1, m2, 2, 2)).
    """
    B, C = x.shape
    M = weights.shape[1]
    assert M == 4 * modes1 * modes2
    half = M // 2

    # ---- column permutation: [re cols | im cols] --------------------------
    # Original column m = ((i1*m2 + i2)*2 + j)*2 + k, with k=0 real / k=1 imag.
    # Grouping even/odd columns keeps the kernel output one lane-dense (TB, M)
    # block while letting the post-kernel complex build slice two contiguous
    # halves (no strided even/odd lane gather, no second strided HBM pass).
    # In a real model the parameters would be stored pre-permuted.
    w_p = jnp.concatenate([weights[:, 0::2], weights[:, 1::2]], axis=1)
    b_p = jnp.concatenate([bias[:, 0::2], bias[:, 1::2]], axis=1)

    # ---- row-tile selection ------------------------------------------------
    if tb is None:
        # double-buffered x + out tiles ~<= 4 MiB (safe on v7x's 64 MiB VMEM,
        # well inside the 16/32 MiB default scoped limits on v5e/v6e).
        row_bytes = (C + M) * 4 * 2
        tb = max(8, min(1024, (4 * 1024 * 1024) // row_bytes))
    tb = max(8, (tb // 8) * 8)            # sublane-aligned
    tb = min(tb, _round_up(B, 8))
    b_pad = _round_up(B, tb)
    if b_pad != B:                         # ragged tail: pad, slice off below
        x = jnp.pad(x, ((0, b_pad - B), (0, 0)))

    h = pl.pallas_call(
        _freqlinear_kernel,
        out_shape=jax.ShapeDtypeStruct((b_pad, M), jnp.float32),
        grid_spec=pltpu.PrefetchScalarGridSpec(
            num_scalar_prefetch=0,
            grid=(b_pad // tb,),
            in_specs=[
                pl.BlockSpec((tb, C), lambda i: (i, 0)),   # x row tile
                pl.BlockSpec((C, M), lambda i: (0, 0)),    # W: VMEM-resident
                pl.BlockSpec((1, M), lambda i: (0, 0)),    # bias: resident
            ],
            out_specs=pl.BlockSpec((tb, M), lambda i: (i, 0)),
        ),
        compiler_params=pltpu.CompilerParams(
            dimension_semantics=("parallel",),             # rows independent
        ),
    )(x, w_p, b_p)

    # TODO(synk): no zero-copy real->complex bitcast exists in XLA, so the
    # torch.view_as_complex view becomes one contiguous-read lax.complex pass.
    h_re = h[:B, :half].reshape(B, modes1, modes2, 2)
    h_im = h[:B, half:].reshape(B, modes1, modes2, 2)
    return jax.lax.complex(h_re, h_im)


if __name__ == "__main__":
    # Small shapes consistent with the module.
    B = 40                     # rows ("t"); > one tile when tb=16
    in_channel = 4
    modes1, modes2 = 4, 8
    M = 4 * modes1 * modes2    # = 128: lane-dense kernel output

    key = jax.random.PRNGKey(0)
    kx, kw, kb = jax.random.split(key, 3)

    scale = 1.0 / (in_channel + M)
    weights = scale * jax.random.normal(kw, (in_channel, M), dtype=jnp.float32)
    # The module initializes bias to zeros; use random values here so the
    # bias-add path is actually exercised by the correctness check.
    bias = 0.1 * jax.random.normal(kb, (1, M), dtype=jnp.float32)
    x = jax.random.normal(kx, (B, in_channel), dtype=jnp.float32)

    # tb=16 forces a multi-step grid (and a padded final tile) at demo size.
    out = freq_linear(x, weights, bias, modes1, modes2, tb=16)
    out = jax.block_until_ready(out)

    # Pure-JAX reference against the *original* (un-permuted) parameters.
    h_ref = (x @ weights + bias).reshape(B, modes1, modes2, 2, 2)
    ref = h_ref[..., 0] + 1j * h_ref[..., 1]

    assert out.shape == (B, modes1, modes2, 2)
    assert out.dtype == jnp.complex64
    assert jnp.allclose(out, ref, atol=1e-5, rtol=1e-5)

    print("KERNEL_OK")
</pallas_src>

<mosaic_0001>
module attributes {stable_mosaic.version = 11 : i64} {
  func.func @_freqlinear_kernel(%arg0: i32, %arg1: memref<16x4xf32, #tpu.memory_space<vmem>>, %arg2: memref<4x128xf32, #tpu.memory_space<vmem>>, %arg3: memref<1x128xf32, #tpu.memory_space<vmem>>, %arg4: memref<16x128xf32, #tpu.memory_space<vmem>>) attributes {dimension_semantics = [#tpu.dimension_semantics<parallel>], iteration_bounds = array<i64: 3>, scalar_prefetch = 0 : i64, scratch_operands = 0 : i64, tpu.core_type = #tpu.core_type<tc>, window_params = [{transform_indices = @transform_0, window_bounds = array<i64: 16, 4>}, {pipeline_mode = #tpu.pipeline_mode<synchronous>, transform_indices = @transform_1, window_bounds = array<i64: 4, 128>}, {pipeline_mode = #tpu.pipeline_mode<synchronous>, transform_indices = @transform_2, window_bounds = array<i64: 1, 128>}, {transform_indices = @transform_3, window_bounds = array<i64: 16, 128>}]} {
    %c0 = arith.constant 0 : index
    %c0_0 = arith.constant 0 : index
    %0 = vector.load %arg1[%c0, %c0_0] : memref<16x4xf32, #tpu.memory_space<vmem>>, vector<16x4xf32>
    %c0_1 = arith.constant 0 : index
    %c0_2 = arith.constant 0 : index
    %1 = vector.load %arg2[%c0_1, %c0_2] : memref<4x128xf32, #tpu.memory_space<vmem>>, vector<4x128xf32>
    %cst = arith.constant dense<0.000000e+00> : vector<16x128xf32>
    %2 = tpu.matmul %0, %1, %cst {dimension_numbers = #tpu.dot_dimension_numbers<[1], [0], [0], [1], [0, 0, 1, 1], [], []>} : vector<16x4xf32>, vector<4x128xf32>, vector<16x128xf32> -> vector<16x128xf32>
    %c0_3 = arith.constant 0 : index
    %c0_4 = arith.constant 0 : index
    %3 = vector.load %arg3[%c0_3, %c0_4] : memref<1x128xf32, #tpu.memory_space<vmem>>, vector<1x128xf32>
    %4 = vector.broadcast %3 : vector<1x128xf32> to vector<16x128xf32>
    %5 = arith.addf %2, %4 : vector<16x128xf32>
    %c0_5 = arith.constant 0 : index
    %c0_6 = arith.constant 0 : index
    %6 = vector.load %arg4[%c0_5, %c0_6] : memref<16x128xf32, #tpu.memory_space<vmem>>, vector<16x128xf32>
    tpu.vector_store %arg4[%c0_5, %c0_6], %5 {strides = array<i32>} : memref<16x128xf32, #tpu.memory_space<vmem>>, vector<16x128xf32>,
    return
  }
  func.func @transform_0(%arg0: i32) -> (i32, i32) {
    %c0_i32 = arith.constant 0 : i32
    %c0_i32_0 = arith.constant 0 : i32
    return %arg0, %c0_i32 : i32, i32
  }
  func.func @transform_1(%arg0: i32) -> (i32, i32) {
    %c0_i32 = arith.constant 0 : i32
    %c0_i32_0 = arith.constant 0 : i32
    %c0_i32_1 = arith.constant 0 : i32
    return %c0_i32, %c0_i32_0 : i32, i32
  }
  func.func @transform_2(%arg0: i32) -> (i32, i32) {
    %c0_i32 = arith.constant 0 : i32
    %c0_i32_0 = arith.constant 0 : i32
    %c0_i32_1 = arith.constant 0 : i32
    return %c0_i32, %c0_i32_0 : i32, i32
  }
  func.func @transform_3(%arg0: i32) -> (i32, i32) {
    %c0_i32 = arith.constant 0 : i32
    %c0_i32_0 = arith.constant 0 : i32
    return %arg0, %c0_i32 : i32, i32
  }
}

</mosaic_0001>

<bundles_post_ra>
// kernel: tpu_custom_call.1
= control target key start
LH: loop header
LB: loop body
LE: loop exit
PB: predicated region body
PF: predicated region fallthrough
CT: control target
= control target key end

     0   :  { %8 = vsyncpa [#allocation3], 0  ;;  %s607_s0 = inlined_call_operand.vmem [shape: f32[48,4], index: 0, kind: input, shape index: {}]   ;;  %s608_s1 = inlined_call_operand.vmem [shape: f32[4,128], index: 1, kind: input, shape index: {}]   ;;  %s609_s2 = inlined_call_operand.vmem [shape: f32[1,128], index: 2, kind: input, shape index: {}]   ;;  %s610_s3 = inlined_call_operand.hbm [shape: f32[48,128], index: 3, kind: output, shape index: {}]  }
   0x1   :  { %10 = vsyncpa [#allocation3 + $0x1], 0  ;;  %s499_s12 = smov 0   ;;  %s501_s13 = smov 0  }
   0x2   :  { %s503_s14 = smov 0   ;;  %s505_s15 = smov 0  }
   0x3 LB: > { %s520_s16 = sadd.s32 4294967295, %s474_s15   ;;  %s346_s17 = sadd.s32 4294967294, %s474_s15   ;;  %s474_s15 = sphi %s505_s15, %s616_s15   ;;  %s470_s14 = sphi %s503_s14, %s615_s14   ;;  %s466_s13 = sphi %s501_s13, %s614_s13   ;;  %s462_s12 = sphi %s499_s12, %s613_s12  }
   0x4   : > { %s524_s18 = sadd.s32 1, %s474_s15   ;;  %s91_s19 = sadd.s32 1, %s470_s14 }
   0x5   : > { %s88_s20 = ssub.s32 %s474_s15, %s524_s18  ;;  %p101_p0 = scmp.ne.s32.totalorder %s470_s14, %s466_s13 }
   0x6   : > { %p89_p1 = scmp.eq.s32.totalorder %s88_s20, 0  ;;  %p102_p2 = scmp.eq.s32.totalorder %s520_s16, 2 }
   0x7   : > { %p107_p3 = scmp.ne.s32.totalorder %s466_s13, %s462_s12  ;;  %p108_p4 = scmp.eq.s32.totalorder %s346_s17, 2 }
   0x8   : > { %s535_s21 = scalar_select %p89_p1, %s470_s14, %s91_s19  }
   0x9   : > { %p537_p5 = por %p102_p2, %p101_p0  ;;  %p541_p6 = por %p108_p4, %p107_p3 }
   0xa   : > { %p349_p7 = scmp.ge.s32.totalorder %s474_s15, 1  ;;  %p141_p8 = scmp.lt.s32.totalorder %s474_s15, 4 }
   0xc   : > { %p142_p9 = pnand %p349_p7, %p141_p8 }
   0xd   : > { %v174_v0 = vld [vmem:[%s608_s1] sm:$0xf] (!%p142_p9)  ;;  %vm189_vm0 = vcmask (!%p142_p9), 1043456   ;;  %s351_s26 = sshll.u32 (!%p142_p9), %s520_s16, 1  ;;  %vm182_vm1 = vcmask (!%p142_p9), 31744   ;;  %s162_s4 = sand.u32 (!%p142_p9), 1, %s466_s13  }
   0xe   : > { %145 = sbr.rel (%p142_p9) target bundleno = 256 (0x100), region = 32  ;;  %366 = vmatprep.subr.msk.mxu0 (!%p142_p9), %vm189_vm0, %v174_v0  ;;  %p166_p10 = scmp.lt.s32.totalorder (!%p142_p9), %s351_s26, 5  ;;  %v353_v3 = vld [vmem:[%s609_s2] ss:$0 sm:$0xff] (!%p142_p9) }
   0xf   : > { %367 = vmatpush3.msk.msra.mxu0 (!%p142_p9), %vm189_vm0, %v174_v0  ;;  %s350_s5 = sshll.u32 (!%p142_p9), %s162_s4, 4  ;;  %s362_s10 = sshll.u32 (!%p142_p9), %s520_s16, 8 }
  0x10   : > { %s164_s8 = scalar_lea.vmem (!%p142_p9), [#allocation2], %s350_s5  ;;  %s564_s19 = scalar_lea.hbm (!%p142_p9), %s610_s3, %s362_s10 }
  0x11   : > { %s284_s9 = sshll.u32 (!%p142_p9), %s164_s8, 4  ;;  %s566_s20 = scalar_lea.sflag (!%p142_p9), [#allocation3], %s162_s4  ;;  %s559_s9 = int_to_ptr.vmem [resolvable:$true] %s284_s9 }
  0x12   : > { %s412_s24 = scalar_lea.vmem (!%p142_p9), %s559_s9, 256  ;;  %s476_s16 = smov (!%p142_p9), [#allocation2]  }
  0x13   : > { %p413_p11 = scmp.ne.s32.totalorder (!%p142_p9), %s559_s9, %s412_s24  ;;  %s416_s25 = sshll.u32 (!%p142_p9), %s476_s16, 4  ;;  %s417_s25 = int_to_ptr.vmem [resolvable:$false] %s416_s25 }
  0x14   : > { %p419_p0 = scmp.lt.s32.totalorder (!%p142_p9), %s559_s9, %s417_s25 }
  0x15   : > { %s618_s26 = smov (!%p166_p10, %s351_s26), 5  ;;  %p414_p12 = pnand %p413_p11, %p537_p5 }
  0x16   : > { %s352_s27 = sshll.u32 %s618_s26, 3  ;;  %s418_s26 = scalar_lea.vmem %s417_s25, 512 }
  0x17   : > { %s169_s30 = scalar_lea.vmem %s607_s0, %s352_s27  ;;  %p415_p13 = pneg %p414_p12 }
  0x18   : > { %v172_v1 = vld [vmem:[%s169_s30] sm:$0xff]  ;;  %v173_v2 = vld [vmem:[%s169_s30 + $0x8] sm:$0xff]  ;;  %p420_p1 = scmp.lt.s32.totalorder %s418_s26, %s412_s24 }
  0x19   : > { %368 = vmatprep.mubr.msk.f32.mxu0 %vm182_vm1, %v172_v1 }
  0x1a   : > { %369 = vmatmul.mubr.msk.f32.vlgmr.msra.gmra.mrb[0].mxu0 %vm182_vm1, %v173_v2  ;;  %p421_p2 = por %p420_p1, %p419_p0 }
  0x1c   : > { %p422_p3 = pnand %p421_p2, %p415_p13 }
  0xed   : > { %v370_v4 = vpop.f32.mrb[0].mxu0 }
  0xee   : > { %v265_v5 = vadd.f32 %v370_v4, %v353_v3  ;;  %v259_v6 = vpop.f32.mrb[1].mxu0 }
  0xef   : > { %v260_v7 = vadd.f32 %v353_v3, %v259_v6 }
  0xf0   : > { %269 = vst [vmem:[%s164_s8 + $0x8] sm:$0xff] %v265_v5 }
  0xf1   : > { %268 = vst [vmem:[%s164_s8] sm:$0xff] %v260_v7 }
  0xf2   : > { %425 = shalt.err (!%p422_p3)
}
  0xf3   : > { %s426_s27 = scalar_lea.hbm %s564_s19, 256  ;;  %s430_s30 = scalar_lea.hbm %s610_s3, 768 }
  0xf4   : > { %p427_p4 = scmp.ne.s32.totalorder %s564_s19, %s426_s27  ;;  %p431_p9 = scmp.lt.u32.totalorder %s564_s19, %s610_s3 }
  0xf5   : > { %p432_p10 = scmp.lt.u32.totalorder %s430_s30, %s426_s27  ;;  %p434_p12 = scmp.lt.u32.totalorder %s426_s27, %s564_s19 }
  0xf6   : > { %p428_p7 = pnand %p427_p4, %p537_p5 }
  0xf7   : > { %p433_p11 = por %p432_p10, %p431_p9 }
  0xf8   : > { %p429_p8 = pneg %p428_p7 }
  0xf9   : > { %p435_p13 = por %p434_p12, %p433_p11 }
  0xfb   : > { %p436_p0 = pnand %p435_p13, %p429_p8 }
  0xfd   : > { %439 = shalt.err (!%p436_p0)
}
  0xfe   : > { %s477_s6 = smov 128   ;;  %s478_s7 = smov 8  }
  0xff   : > { %371 = dma.vmem_to_hbm [thread:$0]  (%p537_p5), %s559_s9, 256, %s564_s19, %s566_s20, %s477_s6, %s477_s6, %s478_s7  }
 0x100 PF: > { %p377_p1 = scmp.ge.s32.totalorder %s474_s15, 2  ;;  %s299_s8 = sand.u32 1, %s462_s12  }
 0x101   : > { %s300_s10 = scalar_lea.sflag [#allocation3], %s299_s8 }
 0x102   : > { %p374_p2 = pnand %p377_p1, %p541_p6 }
 0x104   : > { %457 = dma.done.wait (!%p374_p2), %s300_s10, 256  }
 0x105   : > { %459 = vsyncadd (!%p374_p2), %s300_s10, 4294967040  ;;  %p13_p3 = scmp.ge.s32.totalorder %s524_s18, 5   ;;  %s613_s12 = smov %s466_s13 }
 0x106   : > { %s614_s13 = smov %s470_s14  ;;  %s615_s14 = smov %s535_s21 }
 0x107   : > { %s616_s15 = smov %s524_s18  ;;  %15 = sbr.rel (!%p13_p3) target bundleno = 3 (0x3), region = 67 }
 0x10e   :  { %305 = vsyncpa [#allocation3], 1 }
 0x10f   :  { %307 = vsyncpa [#allocation3 + $0x1], 1 }

</bundles_post_ra>
